<compile_context>
chip_gen: v6e
topology: v6e:2x2x1
jax: 0.10.0
libtpu: 0.0.40
codegen_flags: <defaults>
</compile_context>

<pallas_src>
import functools

import jax
import jax.numpy as jnp
from jax.experimental import pallas as pl
from jax.experimental.pallas import tpu as pltpu

LANE = 128      # vreg lane width
SUBLANE = 8     # vreg sublane width


def _round_up(n, m):
    return ((n + m - 1) // m) * m


def _pad2d(a, rows, cols):
    return jnp.pad(a, ((0, rows - a.shape[0]), (0, cols - a.shape[1])))


def _make_mlp_kernel(n_layers, compute_dtype, nonlinearity):
    """Fused MLP kernel over one (block_b, F_pad) batch tile.

    Hot path: n_layers MXU matmuls + (n_layers - 1) activations (EUP/VPU),
    all on lane-dense 128-padded feature tiles.
    """
    if nonlinearity == "tanh":
        act = jnp.tanh
    else:  # 'relu'
        act = lambda v: jnp.maximum(v, 0.0)

    def kernel(x_ref, *refs):
        o_ref = refs[-1]
        wb_refs = refs[:-1]
        h = x_ref[...]                                    # (block_b, F) bf16/f32
        for li in range(n_layers):
            w_ref = wb_refs[2 * li]
            b_ref = wb_refs[2 * li + 1]
            # MXU matmul with f32 accumulation; bias add in f32 on the VPU.
            h = jnp.dot(h, w_ref[...],
                        preferred_element_type=jnp.float32) + b_ref[...]
            if li < n_layers - 1:
                # Activation in f32 (v5e EUP has no bf16); recast only for the
                # next MXU pass.  Padded hidden lanes are exactly 0 ->
                # tanh(0)=0 / relu(0)=0, so padding never contaminates real
                # lanes.
                h = act(h).astype(compute_dtype)
        o_ref[...] = h.astype(o_ref.dtype)

    return kernel


@functools.partial(jax.jit, static_argnames=("block_b", "use_bf16", "nonlinearity"))
def fc_network_forward(x, params, *, block_b=512, use_bf16=True,
                       nonlinearity="tanh"):
    """x: (B, obs_dim) float32; params: tuple of (w, b) pairs with
    w: (in_features, out_features), b: (out_features,).
    Computes out = ... tanh(tanh(x@W0+b0)@W1+b1) ... @Wn+bn  (tanh between
    layers only), matching FCNetwork.forward.
    """
    B, obs_dim = x.shape
    del obs_dim
    n_layers = len(params)
    act_dim = params[-1][0].shape[1]

    cd = jnp.bfloat16 if use_bf16 else jnp.float32

    # ---- pad every feature dim to the 128-lane width ------------------------
    sizes = [params[0][0].shape[0]] + [w.shape[1] for (w, _) in params]
    padded = [_round_up(s, LANE) for s in sizes]

    padded_params = []
    for li, (w, b) in enumerate(params):
        w_p = _pad2d(w, padded[li], padded[li + 1]).astype(cd)          # MXU bf16
        b_p = _pad2d(b.reshape(1, -1), 1, padded[li + 1]).astype(jnp.float32)
        padded_params.extend([w_p, b_p])

    # ---- pad batch to a multiple of the batch tile ---------------------------
    eff_block = min(block_b, _round_up(B, SUBLANE))
    eff_block = max(SUBLANE, _round_up(eff_block, SUBLANE))
    B_pad = _round_up(B, eff_block)

    x_p = _pad2d(x, B_pad, padded[0]).astype(cd)

    grid = (B_pad // eff_block,)

    # x tile marches over the batch; weights/biases are VMEM-resident.
    in_specs = [pl.BlockSpec((eff_block, padded[0]), lambda i: (i, 0))]
    for li in range(n_layers):
        in_specs.append(pl.BlockSpec((padded[li], padded[li + 1]), lambda i: (0, 0)))
        in_specs.append(pl.BlockSpec((1, padded[li + 1]), lambda i: (0, 0)))

    out_spec = pl.BlockSpec((eff_block, padded[-1]), lambda i: (i, 0))

    # Advisory cost estimate (mem-bound MLP) for the XLA scheduler.
    flops = 2 * B_pad * sum(padded[i] * padded[i + 1] for i in range(n_layers))
    transcendentals = B_pad * sum(padded[1:-1])
    bytes_accessed = (
        x_p.size * x_p.dtype.itemsize
        + sum(int(a.size) * a.dtype.itemsize for a in padded_params)
        + B_pad * padded[-1] * 4
    )

    out_p = pl.pallas_call(
        _make_mlp_kernel(n_layers, cd, nonlinearity),
        out_shape=jax.ShapeDtypeStruct((B_pad, padded[-1]), jnp.float32),
        grid_spec=pltpu.PrefetchScalarGridSpec(
            num_scalar_prefetch=0,
            grid=grid,
            in_specs=in_specs,
            out_specs=out_spec,
        ),
        compiler_params=pltpu.CompilerParams(
            dimension_semantics=("parallel",),
        ),
        cost_estimate=pl.CostEstimate(
            flops=flops,
            transcendentals=transcendentals,
            bytes_accessed=bytes_accessed,
        ),
    )(x_p, *padded_params)

    # Slice off batch and feature padding outside the kernel.
    return out_p[:B, :act_dim]


def init_fc_params(key, layer_sizes):
    """Deterministic init mimicking nn.Linear default (uniform +/- 1/sqrt(fan_in)).

    Weights are stored (in_features, out_features) so the kernel computes
    x @ W + b (== PyTorch's x @ W.T + b with W stored transposed here).
    """
    params = []
    for i in range(len(layer_sizes) - 1):
        fan_in, fan_out = layer_sizes[i], layer_sizes[i + 1]
        key, kw, kb = jax.random.split(key, 3)
        bound = 1.0 / jnp.sqrt(fan_in)
        w = jax.random.uniform(kw, (fan_in, fan_out), jnp.float32, -bound, bound)
        b = jax.random.uniform(kb, (fan_out,), jnp.float32, -bound, bound)
        params.append((w, b))
    return tuple(params)


def fc_network_reference(x, params, *, use_bf16=True, nonlinearity="tanh"):
    """Pure-JAX reference matching FCNetwork.forward semantics, with the same
    bf16-operand / f32-accumulate precision as the kernel when use_bf16=True."""
    act = jnp.tanh if nonlinearity == "tanh" else jax.nn.relu
    cd = jnp.bfloat16 if use_bf16 else jnp.float32
    h = x
    for li, (w, b) in enumerate(params):
        h = jnp.dot(h.astype(cd), w.astype(cd),
                    preferred_element_type=jnp.float32) + b.astype(jnp.float32)
        if li < len(params) - 1:
            h = act(h)
    return h


if __name__ == "__main__":
    # FCNetwork(obs_dim=16, act_dim=4, hidden_sizes=(64, 64), nonlinearity='tanh')
    obs_dim, act_dim = 16, 4
    hidden_sizes = (64, 64)
    layer_sizes = (obs_dim,) + hidden_sizes + (act_dim,)

    key = jax.random.PRNGKey(0)
    key, kx = jax.random.split(key)
    params = init_fc_params(key, layer_sizes)

    # Small, deliberately ragged batch (padded to 40 rows -> single grid step).
    batch = 37
    x = jax.random.normal(kx, (batch, obs_dim), jnp.float32)

    out = fc_network_forward(x, params, use_bf16=True)
    out = jax.block_until_ready(out)
    assert out.shape == (batch, act_dim), out.shape

    # Precision-matched reference (same bf16 operands / f32 accumulation).
    ref_matched = fc_network_reference(x, params, use_bf16=True)
    err_matched = float(jnp.max(jnp.abs(out - ref_matched)))
    assert err_matched < 1e-3, err_matched

    # Full-f32 module semantics: bf16 MXU operands only cost a small tolerance.
    ref_f32 = fc_network_reference(x, params, use_bf16=False)
    err_f32 = float(jnp.max(jnp.abs(out - ref_f32)))
    assert err_f32 < 5e-2, err_f32

    # Also exercise the multi-grid-step (batch-tiled) path at small shapes:
    # block_b=16 -> B_pad=48 -> 3 parallel grid steps.
    out_tiled = jax.block_until_ready(
        fc_network_forward(x, params, block_b=16, use_bf16=True))
    err_tiled = float(jnp.max(jnp.abs(out_tiled - ref_matched)))
    assert err_tiled < 1e-3, err_tiled

    print("KERNEL_OK")
</pallas_src>

<mosaic_0001>
module attributes {stable_mosaic.version = 11 : i64} {
  func.func @kernel(%arg0: i32, %arg1: memref<40x128xbf16, #tpu.memory_space<vmem>>, %arg2: memref<128x128xbf16, #tpu.memory_space<vmem>>, %arg3: memref<1x128xf32, #tpu.memory_space<vmem>>, %arg4: memref<128x128xbf16, #tpu.memory_space<vmem>>, %arg5: memref<1x128xf32, #tpu.memory_space<vmem>>, %arg6: memref<128x128xbf16, #tpu.memory_space<vmem>>, %arg7: memref<1x128xf32, #tpu.memory_space<vmem>>, %arg8: memref<40x128xf32, #tpu.memory_space<vmem>>) attributes {dimension_semantics = [#tpu.dimension_semantics<parallel>], iteration_bounds = array<i64: 1>, scalar_prefetch = 0 : i64, scratch_operands = 0 : i64, tpu.core_type = #tpu.core_type<tc>, window_params = [{transform_indices = @transform_0, window_bounds = array<i64: 40, 128>}, {pipeline_mode = #tpu.pipeline_mode<synchronous>, transform_indices = @transform_1, window_bounds = array<i64: 128, 128>}, {pipeline_mode = #tpu.pipeline_mode<synchronous>, transform_indices = @transform_2, window_bounds = array<i64: 1, 128>}, {pipeline_mode = #tpu.pipeline_mode<synchronous>, transform_indices = @transform_3, window_bounds = array<i64: 128, 128>}, {pipeline_mode = #tpu.pipeline_mode<synchronous>, transform_indices = @transform_4, window_bounds = array<i64: 1, 128>}, {pipeline_mode = #tpu.pipeline_mode<synchronous>, transform_indices = @transform_5, window_bounds = array<i64: 128, 128>}, {pipeline_mode = #tpu.pipeline_mode<synchronous>, transform_indices = @transform_6, window_bounds = array<i64: 1, 128>}, {transform_indices = @transform_7, window_bounds = array<i64: 40, 128>}]} {
    %c0 = arith.constant 0 : index
    %c0_0 = arith.constant 0 : index
    %0 = vector.load %arg1[%c0, %c0_0] : memref<40x128xbf16, #tpu.memory_space<vmem>>, vector<40x128xbf16>
    %c0_1 = arith.constant 0 : index
    %c0_2 = arith.constant 0 : index
    %1 = vector.load %arg2[%c0_1, %c0_2] : memref<128x128xbf16, #tpu.memory_space<vmem>>, vector<128x128xbf16>
    %cst = arith.constant dense<0.000000e+00> : vector<40x128xf32>
    %2 = tpu.matmul %0, %1, %cst {dimension_numbers = #tpu.dot_dimension_numbers<[1], [0], [0], [1], [0, 0, 1, 1], [], []>} : vector<40x128xbf16>, vector<128x128xbf16>, vector<40x128xf32> -> vector<40x128xf32>
    %c0_3 = arith.constant 0 : index
    %c0_4 = arith.constant 0 : index
    %3 = vector.load %arg3[%c0_3, %c0_4] : memref<1x128xf32, #tpu.memory_space<vmem>>, vector<1x128xf32>
    %4 = vector.broadcast %3 : vector<1x128xf32> to vector<40x128xf32>
    %5 = arith.addf %2, %4 : vector<40x128xf32>
    %6 = math.tanh %5 : vector<40x128xf32>
    %7 = arith.truncf %6 : vector<40x128xf32> to vector<40x128xbf16>
    %c0_5 = arith.constant 0 : index
    %c0_6 = arith.constant 0 : index
    %8 = vector.load %arg4[%c0_5, %c0_6] : memref<128x128xbf16, #tpu.memory_space<vmem>>, vector<128x128xbf16>
    %cst_7 = arith.constant dense<0.000000e+00> : vector<40x128xf32>
    %9 = tpu.matmul %7, %8, %cst_7 {dimension_numbers = #tpu.dot_dimension_numbers<[1], [0], [0], [1], [0, 0, 1, 1], [], []>} : vector<40x128xbf16>, vector<128x128xbf16>, vector<40x128xf32> -> vector<40x128xf32>
    %c0_8 = arith.constant 0 : index
    %c0_9 = arith.constant 0 : index
    %10 = vector.load %arg5[%c0_8, %c0_9] : memref<1x128xf32, #tpu.memory_space<vmem>>, vector<1x128xf32>
    %11 = vector.broadcast %10 : vector<1x128xf32> to vector<40x128xf32>
    %12 = arith.addf %9, %11 : vector<40x128xf32>
    %13 = math.tanh %12 : vector<40x128xf32>
    %14 = arith.truncf %13 : vector<40x128xf32> to vector<40x128xbf16>
    %c0_10 = arith.constant 0 : index
    %c0_11 = arith.constant 0 : index
    %15 = vector.load %arg6[%c0_10, %c0_11] : memref<128x128xbf16, #tpu.memory_space<vmem>>, vector<128x128xbf16>
    %cst_12 = arith.constant dense<0.000000e+00> : vector<40x128xf32>
    %16 = tpu.matmul %14, %15, %cst_12 {dimension_numbers = #tpu.dot_dimension_numbers<[1], [0], [0], [1], [0, 0, 1, 1], [], []>} : vector<40x128xbf16>, vector<128x128xbf16>, vector<40x128xf32> -> vector<40x128xf32>
    %c0_13 = arith.constant 0 : index
    %c0_14 = arith.constant 0 : index
    %17 = vector.load %arg7[%c0_13, %c0_14] : memref<1x128xf32, #tpu.memory_space<vmem>>, vector<1x128xf32>
    %18 = vector.broadcast %17 : vector<1x128xf32> to vector<40x128xf32>
    %19 = arith.addf %16, %18 : vector<40x128xf32>
    %c0_15 = arith.constant 0 : index
    %c0_16 = arith.constant 0 : index
    %20 = vector.load %arg8[%c0_15, %c0_16] : memref<40x128xf32, #tpu.memory_space<vmem>>, vector<40x128xf32>
    tpu.vector_store %arg8[%c0_15, %c0_16], %19 {strides = array<i32>} : memref<40x128xf32, #tpu.memory_space<vmem>>, vector<40x128xf32>,
    return
  }
  func.func @transform_0(%arg0: i32) -> (i32, i32) {
    %c0_i32 = arith.constant 0 : i32
    %c0_i32_0 = arith.constant 0 : i32
    return %arg0, %c0_i32 : i32, i32
  }
  func.func @transform_1(%arg0: i32) -> (i32, i32) {
    %c0_i32 = arith.constant 0 : i32
    %c0_i32_0 = arith.constant 0 : i32
    %c0_i32_1 = arith.constant 0 : i32
    return %c0_i32, %c0_i32_0 : i32, i32
  }
  func.func @transform_2(%arg0: i32) -> (i32, i32) {
    %c0_i32 = arith.constant 0 : i32
    %c0_i32_0 = arith.constant 0 : i32
    %c0_i32_1 = arith.constant 0 : i32
    return %c0_i32, %c0_i32_0 : i32, i32
  }
  func.func @transform_3(%arg0: i32) -> (i32, i32) {
    %c0_i32 = arith.constant 0 : i32
    %c0_i32_0 = arith.constant 0 : i32
    %c0_i32_1 = arith.constant 0 : i32
    return %c0_i32, %c0_i32_0 : i32, i32
  }
  func.func @transform_4(%arg0: i32) -> (i32, i32) {
    %c0_i32 = arith.constant 0 : i32
    %c0_i32_0 = arith.constant 0 : i32
    %c0_i32_1 = arith.constant 0 : i32
    return %c0_i32, %c0_i32_0 : i32, i32
  }
  func.func @transform_5(%arg0: i32) -> (i32, i32) {
    %c0_i32 = arith.constant 0 : i32
    %c0_i32_0 = arith.constant 0 : i32
    %c0_i32_1 = arith.constant 0 : i32
    return %c0_i32, %c0_i32_0 : i32, i32
  }
  func.func @transform_6(%arg0: i32) -> (i32, i32) {
    %c0_i32 = arith.constant 0 : i32
    %c0_i32_0 = arith.constant 0 : i32
    %c0_i32_1 = arith.constant 0 : i32
    return %c0_i32, %c0_i32_0 : i32, i32
  }
  func.func @transform_7(%arg0: i32) -> (i32, i32) {
    %c0_i32 = arith.constant 0 : i32
    %c0_i32_0 = arith.constant 0 : i32
    return %arg0, %c0_i32 : i32, i32
  }
}

</mosaic_0001>

<bundles_post_ra>
// kernel: fc_network_forward.1
= control target key start
LH: loop header
LB: loop body
LE: loop exit
PB: predicated region body
PF: predicated region fallthrough
CT: control target
= control target key end

     0   :  { %v666_v0 = vmov 0.0   ;;  %vm667_vm0 = vmmov 0   ;;  %s863_s1 = inlined_call_operand.vmem [shape: bf16[128,128], index: 1, kind: input, shape index: {}]   ;;  %s864_s0 = inlined_call_operand.vmem [shape: bf16[40,128], index: 0, kind: input, shape index: {}]   ;;  %s865_s3 = inlined_call_operand.vmem [shape: bf16[128,128], index: 3, kind: input, shape index: {}]   ;;  %s866_s5 = inlined_call_operand.vmem [shape: bf16[128,128], index: 5, kind: input, shape index: {}]   ;;  %s867_s2 = inlined_call_operand.vmem [shape: f32[1,128], index: 2, kind: input, shape index: {}]   ;;  %s868_s4 = inlined_call_operand.vmem [shape: f32[1,128], index: 4, kind: input, shape index: {}]   ;;  %s869_s6 = inlined_call_operand.vmem [shape: f32[1,128], index: 6, kind: input, shape index: {}]   ;;  %s870_s7 = inlined_call_operand.vmem [shape: f32[40,128], index: 7, kind: output, shape index: {}]  }
   0x1   :  { %517 = vmatprep.subr.bf16.mxu0 %v666_v0  ;;  %v619_v1 = vld [vmem:[%s863_s1 + $0x38] sm:$0xff]   ;;  %533 = vmatprep.mubr.msk.bf16.mxu0 %vm667_vm0, %v666_v0  ;;  %v620_v2 = vld [vmem:[%s863_s1 + $0x30] sm:$0xff]   ;;  %v621_v3 = vld [vmem:[%s863_s1 + $0x28] sm:$0xff]  }
   0x2   :  { %545 = vmatprep.subr.bf16.mxu1 %v666_v0  ;;  %561 = vmatprep.mubr.msk.bf16.mxu1 %vm667_vm0, %v666_v0  ;;  %v622_v4 = vld [vmem:[%s863_s1 + $0x20] sm:$0xff]   ;;  %v630_v5 = vld [vmem:[%s865_s3 + $0x38] sm:$0xff]   ;;  %v631_v7 = vld [vmem:[%s865_s3 + $0x30] sm:$0xff]  }
   0x3   :  { %518 = vmatpush3.bf16.msra.mxu0 %v619_v1  ;;  %v623_v6 = vld [vmem:[%s863_s1 + $0x18] sm:$0xff]   ;;  %546 = vmatpush3.bf16.msra.mxu1 %v630_v5  ;;  %v624_v8 = vld [vmem:[%s863_s1 + $0x10] sm:$0xff]   ;;  %v625_v9 = vld [vmem:[%s863_s1 + $0x8] sm:$0xff]  }
   0x4   :  { %519 = vmatprep.subr.bf16.mxu0 %v666_v0  ;;  %547 = vmatprep.subr.bf16.mxu1 %v666_v0  ;;  %v626_v10 = vld [vmem:[%s863_s1] sm:$0xff]   ;;  %v628_v12 = vld [vmem:[%s864_s0 + $0x8] sm:$0xff]   ;;  %v629_v13 = vld [vmem:[%s864_s0 + $0x10] ss:$0 sps:$4 sm:$0xff]  }
   0x5   :  { %v627_v11 = vld [vmem:[%s864_s0] sm:$0xff]   ;;  %v632_v14 = vld [vmem:[%s865_s3 + $0x28] sm:$0xff]   ;;  %v634_v16 = vld [vmem:[%s865_s3 + $0x18] sm:$0xff]  }
   0x6   :  { %v633_v15 = vld [vmem:[%s865_s3 + $0x20] sm:$0xff]   ;;  %v635_v17 = vld [vmem:[%s865_s3 + $0x10] sm:$0xff]   ;;  %v636_v18 = vld [vmem:[%s865_s3 + $0x8] sm:$0xff]  }
   0x7   :  { %520 = vmatpush3.bf16.msra.mxu0 %v620_v2  ;;  %548 = vmatpush3.bf16.msra.mxu1 %v631_v7  ;;  %v637_v19 = vld [vmem:[%s865_s3] sm:$0xff]   ;;  %v638_v20 = vld [vmem:[%s866_s5 + $0x38] sm:$0xff]   ;;  %v639_v21 = vld [vmem:[%s866_s5 + $0x30] sm:$0xff]  }
   0x8   :  { %521 = vmatprep.subr.bf16.mxu0 %v666_v0  ;;  %549 = vmatprep.subr.bf16.mxu1 %v666_v0  ;;  %v454_v22 = vld [vmem:[%s867_s2] ss:$0 sm:$0xff]  ;;  %v640_v48 = vld [vmem:[%s866_s5 + $0x28] sm:$0xff]   ;;  %v642_v50 = vld [vmem:[%s866_s5 + $0x18] sm:$0xff]  }
   0x9   :  { %v641_v49 = vld [vmem:[%s866_s5 + $0x20] sm:$0xff]   ;;  %v643_v51 = vld [vmem:[%s866_s5 + $0x10] sm:$0xff]   ;;  %v644_v52 = vld [vmem:[%s866_s5 + $0x8] sm:$0xff]  }
   0xa   :  { %v645_v53 = vld [vmem:[%s866_s5] sm:$0xff]  }
   0xb   :  { %522 = vmatpush3.bf16.msra.mxu0 %v621_v3  ;;  %550 = vmatpush3.bf16.msra.mxu1 %v632_v14  ;;  %v466_v54 = vld [vmem:[%s868_s4] ss:$0 sm:$0xff] }
   0xc   :  { %523 = vmatprep.subr.bf16.mxu0 %v666_v0  ;;  %551 = vmatprep.subr.bf16.mxu1 %v666_v0 }
   0xf   :  { %524 = vmatpush3.bf16.msra.mxu0 %v622_v4  ;;  %552 = vmatpush3.bf16.msra.mxu1 %v633_v15 }
  0x10   :  { %525 = vmatprep.subr.bf16.mxu0 %v666_v0  ;;  %553 = vmatprep.subr.bf16.mxu1 %v666_v0 }
  0x13   :  { %526 = vmatpush3.bf16.msra.mxu0 %v623_v6  ;;  %554 = vmatpush3.bf16.msra.mxu1 %v634_v16 }
  0x14   :  { %527 = vmatprep.subr.bf16.mxu0 %v666_v0  ;;  %555 = vmatprep.subr.bf16.mxu1 %v666_v0 }
  0x17   :  { %528 = vmatpush3.bf16.msra.mxu0 %v624_v8  ;;  %556 = vmatpush3.bf16.msra.mxu1 %v635_v17  ;;  %v475_v17 = vld [vmem:[%s869_s6] ss:$0 sm:$0xff] }
  0x18   :  { %529 = vmatprep.subr.bf16.mxu0 %v666_v0  ;;  %557 = vmatprep.subr.bf16.mxu1 %v666_v0 }
  0x1b   :  { %530 = vmatpush3.bf16.msra.mxu0 %v625_v9  ;;  %558 = vmatpush3.bf16.msra.mxu1 %v636_v18 }
  0x1c   :  { %531 = vmatprep.subr.bf16.mxu0 %v666_v0  ;;  %559 = vmatprep.subr.bf16.mxu1 %v666_v0 }
  0x1f   :  { %532 = vmatpush3.bf16.msra.mxu0 %v626_v10  ;;  %560 = vmatpush3.bf16.msra.mxu1 %v637_v19 }
  0x20   :  { %573 = vmatprep.subr.bf16.mxu0 %v666_v0  ;;  %601 = vmatprep.subr.bf16.mxu1 %v666_v0 }
  0x22   :  { %534 = vmatmul.mubr.bf16.vlgmr.msra.gmra.mxu0 %v627_v11 }
  0x23   :  { %537 = vmatprep.mubr.msk.bf16.mxu0 %vm667_vm0, %v666_v0  ;;  %574 = vmatpush3.bf16.msra.mxu0 %v638_v20 }
  0x24   :  { %575 = vmatprep.subr.bf16.mxu0 %v666_v0 }
  0x27   :  { %576 = vmatpush3.bf16.msra.mxu0 %v639_v21 }
  0x28   :  { %577 = vmatprep.subr.bf16.mxu0 %v666_v0 }
  0x2a   :  { %538 = vmatmul.mubr.bf16.gmra.mxu0 %v628_v12 }
  0x2b   :  { %541 = vmatprep.mubr.msk.bf16.mxu0 %vm667_vm0, %v666_v0  ;;  %578 = vmatpush3.bf16.msra.mxu0 %v640_v48 }
  0x2c   :  { %579 = vmatprep.subr.bf16.mxu0 %v666_v0 }
  0x2f   :  { %580 = vmatpush3.bf16.msra.mxu0 %v641_v49 }
  0x30   :  { %581 = vmatprep.subr.bf16.mxu0 %v666_v0 }
  0x32   :  { %542 = vmatmul.mubr.bf16.gmra.mxu0 %v629_v13 }
  0x33   :  { %589 = vmatprep.mubr.msk.bf16.mxu0 %vm667_vm0, %v666_v0  ;;  %582 = vmatpush3.bf16.msra.mxu0 %v642_v50 }
  0x34   :  { %583 = vmatprep.subr.bf16.mxu0 %v666_v0 }
  0x37   :  { %584 = vmatpush3.bf16.msra.mxu0 %v643_v51 }
  0x38   :  { %585 = vmatprep.subr.bf16.mxu0 %v666_v0 }
  0x3b   :  { %586 = vmatpush3.bf16.msra.mxu0 %v644_v52 }
  0x3c   :  { %587 = vmatprep.subr.bf16.mxu0 %v666_v0 }
  0x3f   :  { %588 = vmatpush3.bf16.msra.mxu0 %v645_v53 }
  0xe2   :  { %v153_v23 = vpop.f32.mrf.mxu0 }
  0xe3   :  { %v154_v24 = vadd.f32 %v454_v22, %v153_v23 }
  0xe4   :  { %v535_v25 = vpop.f32.mrf.mxu0 }
  0xe5   :  { %646 = vtanh.f32 %v154_v24 }
  0xe6   :  { %v156_v26 = vpop.f32.mrf.mxu0 }
  0xe7   :  { %v157_v27 = vadd.f32 %v454_v22, %v156_v26 }
  0xe8   :  { %v536_v28 = vpop.f32.mrf.mxu0 }
  0xe9   :  { %648 = vtanh.f32 %v157_v27 }
  0xea   :  { %v161_v29 = vpop.f32.mrf.mxu0 }
  0xeb   :  { %v162_v30 = vadd.f32 %v454_v22, %v161_v29 }
  0xec   :  { %v539_v31 = vpop.f32.mrf.mxu0 }
  0xed   :  { %650 = vtanh.f32 %v162_v30 }
  0xee   :  { %v164_v32 = vpop.f32.mrf.mxu0 }
  0xef   :  { %v165_v33 = vadd.f32 %v454_v22, %v164_v32 }
  0xf0   :  { %v540_v34 = vpop.f32.mrf.mxu0 }
  0xf1   :  { %652 = vtanh.f32 %v165_v33 }
  0xf2   :  { %v169_v35 = vpop.f32.mrf.mxu0  ;;  %v647_v38 = vpop.eup %646 }
  0xf3   :  { %v170_v36 = vadd.f32 %v454_v22, %v169_v35 }
  0xf4   :  { %v543_v37 = vpop.f32.mrf.mxu0 }
  0xf5   :  { %654 = vtanh.f32 %v170_v36 }
  0xf6   :  { %v649_v39 = vpop.eup %648  ;;  %v172_v40 = vpop.f32.mrf.mxu0 }
  0xf7   :  { %v180_v41 = vpack.c.bf16 %v649_v39, %v647_v38 }
  0xf8   :  { %v544_v42 = vpop.f32.mrf.mxu0 }
  0xf9   :  { %562 = vmatmul.mubr.bf16.vlgmr.msra.gmra.mxu1 %v180_v41 }
  0xfa   :  { %565 = vmatprep.mubr.msk.bf16.mxu1 %vm667_vm0, %v666_v0  ;;  %609 = vmatpush3.bf16.msra.mxu1 %v638_v20  ;;  %v651_v43 = vpop.eup %650 }
  0xfb   :  { %602 = vmatprep.subr.bf16.mxu1 %v666_v0 }
  0xfe   :  { %v653_v44 = vpop.eup %652  ;;  %610 = vmatpush3.bf16.msra.mxu1 %v639_v21 }
  0xff   :  { %v181_v45 = vpack.c.bf16 %v653_v44, %v651_v43  ;;  %603 = vmatprep.subr.bf16.mxu1 %v666_v0 }
 0x101   :  { %566 = vmatmul.mubr.bf16.gmra.mxu1 %v181_v45 }
 0x102   :  { %v655_v46 = vpop.eup %654  ;;  %569 = vmatprep.mubr.msk.bf16.mxu1 %vm667_vm0, %v666_v0  ;;  %611 = vmatpush3.bf16.msra.mxu1 %v640_v48 }
 0x103   :  { %v182_v47 = vpack.c.bf16 %v655_v46, %v655_v46  ;;  %604 = vmatprep.subr.bf16.mxu1 %v666_v0 }
 0x106   :  { %612 = vmatpush3.bf16.msra.mxu1 %v641_v49 }
 0x107   :  { %605 = vmatprep.subr.bf16.mxu1 %v666_v0 }
 0x109   :  { %570 = vmatmul.mubr.bf16.gmra.mxu1 %v182_v47 }
 0x10a   :  { %593 = vmatprep.mubr.msk.bf16.mxu1 %vm667_vm0, %v666_v0  ;;  %613 = vmatpush3.bf16.msra.mxu1 %v642_v50 }
 0x10b   :  { %606 = vmatprep.subr.bf16.mxu1 %v666_v0 }
 0x10e   :  { %614 = vmatpush3.bf16.msra.mxu1 %v643_v51 }
 0x10f   :  { %607 = vmatprep.subr.bf16.mxu1 %v666_v0 }
 0x112   :  { %615 = vmatpush3.bf16.msra.mxu1 %v644_v52 }
 0x113   :  { %608 = vmatprep.subr.bf16.mxu1 %v666_v0 }
 0x116   :  { %616 = vmatpush3.bf16.msra.mxu1 %v645_v53 }
 0x1b9   :  { %v288_v55 = vpop.f32.mrf.mxu1 }
 0x1ba   :  { %v289_v56 = vadd.f32 %v466_v54, %v288_v55 }
 0x1bb   :  { %v563_v57 = vpop.f32.mrf.mxu1 }
 0x1bc   :  { %656 = vtanh.f32 %v289_v56 }
 0x1bd   :  { %v291_v58 = vpop.f32.mrf.mxu1 }
 0x1be   :  { %v292_v59 = vadd.f32 %v466_v54, %v291_v58 }
 0x1bf   :  { %v564_v60 = vpop.f32.mrf.mxu1 }
 0x1c0   :  { %658 = vtanh.f32 %v292_v59 }
 0x1c1   :  { %v296_v61 = vpop.f32.mrf.mxu1 }
 0x1c2   :  { %v297_v62 = vadd.f32 %v466_v54, %v296_v61 }
 0x1c3   :  { %v567_v63 = vpop.f32.mrf.mxu1 }
 0x1c4   :  { %660 = vtanh.f32 %v297_v62 }
 0x1c5   :  { %v299_v1 = vpop.f32.mrf.mxu1 }
 0x1c6   :  { %v300_v2 = vadd.f32 %v466_v54, %v299_v1 }
 0x1c7   :  { %v568_v3 = vpop.f32.mrf.mxu1 }
 0x1c8   :  { %662 = vtanh.f32 %v300_v2 }
 0x1c9   :  { %v304_v4 = vpop.f32.mrf.mxu1  ;;  %v657_v7 = vpop.eup %656 }
 0x1ca   :  { %v305_v5 = vadd.f32 %v466_v54, %v304_v4 }
 0x1cb   :  { %v571_v6 = vpop.f32.mrf.mxu1 }
 0x1cc   :  { %664 = vtanh.f32 %v305_v5 }
 0x1cd   :  { %v659_v8 = vpop.eup %658  ;;  %v307_v9 = vpop.f32.mrf.mxu1 }
 0x1ce   :  { %v315_v10 = vpack.c.bf16 %v659_v8, %v657_v7 }
 0x1cf   :  { %v572_v11 = vpop.f32.mrf.mxu1 }
 0x1d0   :  { %590 = vmatmul.mubr.bf16.vlgmr.msra.gmra.mxu0 %v315_v10 }
 0x1d1   :  { %v661_v12 = vpop.eup %660 }
 0x1d5   :  { %v663_v13 = vpop.eup %662 }
 0x1d6   :  { %v316_v14 = vpack.c.bf16 %v663_v13, %v661_v12 }
 0x1d8   :  { %594 = vmatmul.mubr.bf16.vlgmr.msra.gmra.mxu1 %v316_v14 }
 0x1d9   :  { %v665_v15 = vpop.eup %664  ;;  %597 = vmatprep.mubr.msk.bf16.mxu1 %vm667_vm0, %v666_v0 }
 0x1da   :  { %v317_v16 = vpack.c.bf16 %v665_v15, %v665_v15 }
 0x1e0   :  { %598 = vmatmul.mubr.bf16.gmra.mxu1 %v317_v16 }
 0x290   :  { %v423_v18 = vpop.f32.mrf.mxu0 }
 0x291   :  { %v424_v19 = vadd.f32 %v475_v17, %v423_v18 }
 0x292   :  { %v591_v20 = vpop.f32.mrf.mxu0 }
 0x293   :  { %445 = vst [vmem:[%s870_s7] sm:$0xff] %v424_v19 }
 0x294   :  { %v426_v21 = vpop.f32.mrf.mxu0 }
 0x295   :  { %v427_v22 = vadd.f32 %v475_v17, %v426_v21 }
 0x296   :  { %v592_v23 = vpop.f32.mrf.mxu0 }
 0x297   :  { %446 = vst [vmem:[%s870_s7 + $0x8] sm:$0xff] %v427_v22 }
 0x298   :  { %v431_v0 = vpop.f32.mrf.mxu1 }
 0x299   :  { %v432_v24 = vadd.f32 %v475_v17, %v431_v0 }
 0x29a   :  { %v595_v25 = vpop.f32.mrf.mxu1 }
 0x29b   :  { %447 = vst [vmem:[%s870_s7 + $0x10] sm:$0xff] %v432_v24 }
 0x29c   :  { %v434_v26 = vpop.f32.mrf.mxu1 }
 0x29d   :  { %v435_v27 = vadd.f32 %v475_v17, %v434_v26 }
 0x29e   :  { %v596_v28 = vpop.f32.mrf.mxu1 }
 0x29f   :  { %448 = vst [vmem:[%s870_s7 + $0x18] sm:$0xff] %v435_v27 }
 0x2a0   :  { %v439_v29 = vpop.f32.mrf.mxu1 }
 0x2a1   :  { %v440_v30 = vadd.f32 %v475_v17, %v439_v29 }
 0x2a2   :  { %v599_v31 = vpop.f32.mrf.mxu1 }
 0x2a3   :  { %449 = vst [vmem:[%s870_s7 + $0x20] sm:$0xff] %v440_v30 }
 0x2a4   :  { %v442_v32 = vpop.f32.mrf.mxu1 }
 0x2a6   :  { %v600_v33 = vpop.f32.mrf.mxu1 }

</bundles_post_ra>
